<compile_context>
chip_gen: v7x
topology: tpu7x:2x2x1
jax: 0.10.0
libtpu: 0.0.40
codegen_flags: <defaults>
</compile_context>

<pallas_src>
import jax
import jax.numpy as jnp
from jax.experimental import pallas as pl
from jax.experimental.pallas import tpu as pltpu


def _round_up(n, m):
    return ((n + m - 1) // m) * m


def _mlp_kernel(x_ref, th_ref, w1a_ref, w1b_ref, b1_ref, w2_ref, b2_ref,
                w3_ref, b3_ref, wf_ref, bf_ref, out_ref):
    # ---- layer1: Linear(input_dim + theta_dim, 128) + ReLU -----------------
    # concat([x, theta]) is fused: x goes through the MXU (K = input_dim); the
    # K = theta_dim (=3) theta term is done as VPU broadcast-FMAs instead of an
    # almost-empty MXU push (important on v5e's 4x128 MXU).
    x16 = x_ref[...].astype(jnp.bfloat16)
    h = jnp.dot(x16, w1a_ref[...], preferred_element_type=jnp.float32)
    h = h + b1_ref[...]
    th = th_ref[...].astype(jnp.float32)
    w1b = w1b_ref[...]
    for i in range(th_ref.shape[1]):
        h = h + th[:, i:i + 1] * w1b[i:i + 1, :]
    # bias + ReLU + bf16 cast fused in one expression (no extra f32 copy of h)
    a1 = jnp.maximum(h, 0.0).astype(jnp.bfloat16)

    # ---- layer2 / layer3: Linear(128, 128) + ReLU ---------------------------
    h2 = jnp.dot(a1, w2_ref[...], preferred_element_type=jnp.float32)
    a2 = jnp.maximum(h2 + b2_ref[...], 0.0).astype(jnp.bfloat16)
    h3 = jnp.dot(a2, w3_ref[...], preferred_element_type=jnp.float32)
    a3 = jnp.maximum(h3 + b3_ref[...], 0.0)          # stays f32 for the VPU head

    # ---- fc head (num_classes == 1): VPU multiply + lane reduction ---------
    log_ratio = jnp.sum(a3 * wf_ref[...], axis=-1, keepdims=True) + bf_ref[...]

    # ---- numerically stable sigmoid (EUP exp + approximate reciprocal) -----
    e = jnp.exp(-jnp.abs(log_ratio))                 # in (0, 1]; never overflows
    pos = pl.reciprocal(1.0 + e, approx=True)        # sigmoid(|log_ratio|)
    logit = jnp.where(log_ratio >= 0.0, pos, 1.0 - pos)

    # single merged (tb, 2) output block: col 0 = log_ratio, col 1 = logit
    out_ref[:, 0:1] = log_ratio.astype(out_ref.dtype)
    out_ref[:, 1:2] = logit.astype(out_ref.dtype)


def basic_network_forward(x, theta, params, tile_b=4096):
    """x: (B, 12, 12), theta: (B, 3) -> (log_ratio, logit), each (B, 1) f32.

    Inputs may be f32 or bf16; they are NOT force-cast in the wrapper (a bf16
    producer halves the dominant HBM input stream).
    """
    B = x.shape[0]
    x_flat = x.reshape(B, -1)                 # torch.flatten(x, 1); dtype preserved
    input_dim = x_flat.shape[1]
    theta_dim = theta.shape[1]

    w1, b1, w2, b2, w3, b3, wf, bf = params
    num_classes = wf.shape[1]
    assert num_classes == 1, "VPU head path implemented for num_classes == 1"

    # Split layer-1 weight (concat fusion). MXU operands pre-cast to bf16 once;
    # the tiny theta block stays f32 (VPU-FMA path).
    w1a = w1[:input_dim].astype(jnp.bfloat16)                       # (144, 128)
    w1b = w1[input_dim:input_dim + theta_dim].astype(jnp.float32)   # (3, 128)
    w2b = w2.astype(jnp.bfloat16)
    w3b = w3.astype(jnp.bfloat16)
    b1f = b1.reshape(1, -1).astype(jnp.float32)
    b2f = b2.reshape(1, -1).astype(jnp.float32)
    b3f = b3.reshape(1, -1).astype(jnp.float32)
    wf_row = wf.T.astype(jnp.float32)                               # (1, 128)
    bf_sc = bf.reshape(1, 1).astype(jnp.float32)

    # ---- batch tiling -------------------------------------------------------
    tile_b = _round_up(max(int(tile_b), 8), 8)
    tb = min(tile_b, _round_up(B, 8))
    if B >= 2048:
        # guarantee >= 2 grid steps so the "parallel" batch axis can be
        # megacore-sharded on v7x even when B <= tile_b.
        tb = min(tb, _round_up(pl.cdiv(B, 2), 8))
    Bp = _round_up(B, tb)
    if Bp != B:
        pad = Bp - B
        x_flat = jnp.pad(x_flat, ((0, pad), (0, 0)))
        theta = jnp.pad(theta, ((0, pad), (0, 0)))

    grid = (Bp // tb,)
    batch_spec = lambda cols: pl.BlockSpec((tb, cols), lambda i: (i, 0))
    const_spec = lambda shape: pl.BlockSpec(shape, lambda i: (0, 0))

    x_item = jnp.dtype(x_flat.dtype).itemsize
    th_item = jnp.dtype(theta.dtype).itemsize

    # Explicit scoped-VMEM budget for the bigger double-buffered input tiles.
    vmem_need = (2 * tb * input_dim * x_item          # double-buffered x tile
                 + 2 * tb * theta_dim * th_item       # double-buffered theta tile
                 + 2 * tb * 2 * 4                     # double-buffered merged output
                 + 8 * tb * 128 * 4                   # live f32/bf16 activation slabs
                 + (2 << 20))                         # resident weights + slack
    vmem_limit = int(min(max(vmem_need, 32 << 20), 48 << 20))

    # Advisory cost estimate for XLA scheduling around this mem-bound call.
    weight_bytes = sum(int(a.size) * jnp.dtype(a.dtype).itemsize
                       for a in (w1a, w1b, b1f, w2b, b2f, w3b, b3f, wf_row, bf_sc))
    flops = 2 * Bp * (input_dim * 128 + theta_dim * 128
                      + 2 * 128 * 128 + 128 * num_classes)
    bytes_accessed = (Bp * (input_dim * x_item + theta_dim * th_item)
                      + Bp * 2 * 4 + weight_bytes)
    cost = pl.CostEstimate(flops=int(flops), transcendentals=int(Bp),
                           bytes_accessed=int(bytes_accessed))

    out = pl.pallas_call(
        _mlp_kernel,
        out_shape=jax.ShapeDtypeStruct((Bp, 2), jnp.float32),
        grid=grid,
        in_specs=[
            batch_spec(input_dim),            # x_flat tile
            batch_spec(theta_dim),            # theta tile
            const_spec((input_dim, 128)),     # w1a (VMEM-resident)
            const_spec((theta_dim, 128)),     # w1b (VPU-FMA term)
            const_spec((1, 128)),             # b1
            const_spec((128, 128)),           # w2
            const_spec((1, 128)),             # b2
            const_spec((128, 128)),           # w3
            const_spec((1, 128)),             # b3
            const_spec((1, 128)),             # wf row
            const_spec((1, 1)),               # bf
        ],
        out_specs=pl.BlockSpec((tb, 2), lambda i: (i, 0)),
        compiler_params=pltpu.CompilerParams(
            dimension_semantics=("parallel",),
            vmem_limit_bytes=vmem_limit),
        cost_estimate=cost,
    )(x_flat, theta, w1a, w1b, b1f, w2b, b2f, w3b, b3f, wf_row, bf_sc)

    log_ratio = out[:B, 0:1]
    logit = out[:B, 1:2]
    return log_ratio, logit


def init_params(key, input_dim=12 * 12, theta_dim=3, num_classes=1):
    """Deterministic init mimicking PyTorch nn.Linear default (uniform +/- 1/sqrt(fan_in))."""
    dims = [(input_dim + theta_dim, 128), (128, 128), (128, 128), (128, num_classes)]
    params = []
    for (fan_in, fan_out) in dims:
        key, kw, kb = jax.random.split(key, 3)
        bound = 1.0 / jnp.sqrt(jnp.float32(fan_in))
        w = jax.random.uniform(kw, (fan_in, fan_out), jnp.float32, -bound, bound)
        b = jax.random.uniform(kb, (1, fan_out), jnp.float32, -bound, bound)
        params.extend([w, b])
    return tuple(params)


if __name__ == "__main__":
    key = jax.random.PRNGKey(0)
    key, kx, kt = jax.random.split(key, 3)

    B = 2
    x = jax.random.normal(kx, (B, 12, 12), jnp.float32)   # image-like input, flattened to 144
    theta = jax.random.normal(kt, (B, 3), jnp.float32)    # conditioning parameters

    params = init_params(key)

    log_ratio, logit = basic_network_forward(x, theta, params)
    jax.block_until_ready((log_ratio, logit))

    # sanity check against a plain-JAX reference using the same precision recipe
    # as the kernel (bf16 MXU operands, f32 accumulate, f32 theta term / head).
    w1, b1, w2, b2, w3, b3, wf, bf = params
    input_dim = 12 * 12

    def bdot(a, w):
        return jnp.dot(a.astype(jnp.bfloat16), w.astype(jnp.bfloat16),
                       preferred_element_type=jnp.float32)

    xf = x.reshape(B, -1)
    h = jnp.maximum(bdot(xf, w1[:input_dim]) + theta @ w1[input_dim:] + b1, 0.0)
    h = jnp.maximum(bdot(h, w2) + b2, 0.0)
    h = jnp.maximum(bdot(h, w3) + b3, 0.0)
    lr_ref = h @ wf + bf                    # head is f32 in the kernel too
    logit_ref = jax.nn.sigmoid(lr_ref)

    assert log_ratio.shape == (B, 1) and logit.shape == (B, 1)
    assert jnp.allclose(log_ratio, lr_ref, atol=2e-3, rtol=2e-3), "log_ratio mismatch"
    assert jnp.allclose(logit, logit_ref, atol=1e-2), "logit mismatch"  # approx reciprocal

    print("KERNEL_OK")
</pallas_src>

<mosaic_0001>
module attributes {stable_mosaic.version = 11 : i64} {
  func.func @_mlp_kernel(%arg0: i32, %arg1: memref<8x144xf32, #tpu.memory_space<vmem>>, %arg2: memref<8x3xf32, #tpu.memory_space<vmem>>, %arg3: memref<144x128xbf16, #tpu.memory_space<vmem>>, %arg4: memref<3x128xf32, #tpu.memory_space<vmem>>, %arg5: memref<1x128xf32, #tpu.memory_space<vmem>>, %arg6: memref<128x128xbf16, #tpu.memory_space<vmem>>, %arg7: memref<1x128xf32, #tpu.memory_space<vmem>>, %arg8: memref<128x128xbf16, #tpu.memory_space<vmem>>, %arg9: memref<1x128xf32, #tpu.memory_space<vmem>>, %arg10: memref<1x128xf32, #tpu.memory_space<vmem>>, %arg11: memref<1x1xf32, #tpu.memory_space<vmem>>, %arg12: memref<8x2xf32, #tpu.memory_space<vmem>>) attributes {dimension_semantics = [#tpu.dimension_semantics<parallel>], iteration_bounds = array<i64: 1>, scalar_prefetch = 0 : i64, scratch_operands = 0 : i64, tpu.core_type = #tpu.core_type<tc>, window_params = [{transform_indices = @transform_0, window_bounds = array<i64: 8, 144>}, {transform_indices = @transform_1, window_bounds = array<i64: 8, 3>}, {pipeline_mode = #tpu.pipeline_mode<synchronous>, transform_indices = @transform_2, window_bounds = array<i64: 144, 128>}, {pipeline_mode = #tpu.pipeline_mode<synchronous>, transform_indices = @transform_3, window_bounds = array<i64: 3, 128>}, {pipeline_mode = #tpu.pipeline_mode<synchronous>, transform_indices = @transform_4, window_bounds = array<i64: 1, 128>}, {pipeline_mode = #tpu.pipeline_mode<synchronous>, transform_indices = @transform_5, window_bounds = array<i64: 128, 128>}, {pipeline_mode = #tpu.pipeline_mode<synchronous>, transform_indices = @transform_6, window_bounds = array<i64: 1, 128>}, {pipeline_mode = #tpu.pipeline_mode<synchronous>, transform_indices = @transform_7, window_bounds = array<i64: 128, 128>}, {pipeline_mode = #tpu.pipeline_mode<synchronous>, transform_indices = @transform_8, window_bounds = array<i64: 1, 128>}, {pipeline_mode = #tpu.pipeline_mode<synchronous>, transform_indices = @transform_9, window_bounds = array<i64: 1, 128>}, {pipeline_mode = #tpu.pipeline_mode<synchronous>, transform_indices = @transform_10, window_bounds = array<i64: 1, 1>}, {transform_indices = @transform_11, window_bounds = array<i64: 8, 2>}]} {
    %c0 = arith.constant 0 : index
    %c0_0 = arith.constant 0 : index
    %0 = vector.load %arg1[%c0, %c0_0] : memref<8x144xf32, #tpu.memory_space<vmem>>, vector<8x144xf32>
    %1 = arith.truncf %0 : vector<8x144xf32> to vector<8x144xbf16>
    %c0_1 = arith.constant 0 : index
    %c0_2 = arith.constant 0 : index
    %2 = vector.load %arg3[%c0_1, %c0_2] : memref<144x128xbf16, #tpu.memory_space<vmem>>, vector<144x128xbf16>
    %cst = arith.constant dense<0.000000e+00> : vector<8x128xf32>
    %3 = tpu.matmul %1, %2, %cst {dimension_numbers = #tpu.dot_dimension_numbers<[1], [0], [0], [1], [0, 0, 1, 1], [], []>} : vector<8x144xbf16>, vector<144x128xbf16>, vector<8x128xf32> -> vector<8x128xf32>
    %c0_3 = arith.constant 0 : index
    %c0_4 = arith.constant 0 : index
    %4 = vector.load %arg5[%c0_3, %c0_4] : memref<1x128xf32, #tpu.memory_space<vmem>>, vector<1x128xf32>
    %5 = vector.broadcast %4 : vector<1x128xf32> to vector<8x128xf32>
    %6 = arith.addf %3, %5 : vector<8x128xf32>
    %c0_5 = arith.constant 0 : index
    %c0_6 = arith.constant 0 : index
    %7 = vector.load %arg2[%c0_5, %c0_6] : memref<8x3xf32, #tpu.memory_space<vmem>>, vector<8x3xf32>
    %c0_7 = arith.constant 0 : index
    %c0_8 = arith.constant 0 : index
    %8 = vector.load %arg4[%c0_7, %c0_8] : memref<3x128xf32, #tpu.memory_space<vmem>>, vector<3x128xf32>
    %9 = vector.extract_strided_slice %7 {offsets = [0, 0], sizes = [8, 1], strides = [1, 1]} : vector<8x3xf32> to vector<8x1xf32>
    %10 = vector.extract_strided_slice %8 {offsets = [0, 0], sizes = [1, 128], strides = [1, 1]} : vector<3x128xf32> to vector<1x128xf32>
    %11 = vector.broadcast %9 : vector<8x1xf32> to vector<8x128xf32>
    %12 = vector.broadcast %10 : vector<1x128xf32> to vector<8x128xf32>
    %13 = arith.mulf %11, %12 : vector<8x128xf32>
    %14 = arith.addf %6, %13 : vector<8x128xf32>
    %15 = vector.extract_strided_slice %7 {offsets = [0, 1], sizes = [8, 1], strides = [1, 1]} : vector<8x3xf32> to vector<8x1xf32>
    %16 = vector.extract_strided_slice %8 {offsets = [1, 0], sizes = [1, 128], strides = [1, 1]} : vector<3x128xf32> to vector<1x128xf32>
    %17 = vector.broadcast %15 : vector<8x1xf32> to vector<8x128xf32>
    %18 = vector.broadcast %16 : vector<1x128xf32> to vector<8x128xf32>
    %19 = arith.mulf %17, %18 : vector<8x128xf32>
    %20 = arith.addf %14, %19 : vector<8x128xf32>
    %21 = vector.extract_strided_slice %7 {offsets = [0, 2], sizes = [8, 1], strides = [1, 1]} : vector<8x3xf32> to vector<8x1xf32>
    %22 = vector.extract_strided_slice %8 {offsets = [2, 0], sizes = [1, 128], strides = [1, 1]} : vector<3x128xf32> to vector<1x128xf32>
    %23 = vector.broadcast %21 : vector<8x1xf32> to vector<8x128xf32>
    %24 = vector.broadcast %22 : vector<1x128xf32> to vector<8x128xf32>
    %25 = arith.mulf %23, %24 : vector<8x128xf32>
    %26 = arith.addf %20, %25 : vector<8x128xf32>
    %cst_9 = arith.constant 0.000000e+00 : f32
    %27 = vector.broadcast %cst_9 : f32 to vector<8x128xf32>
    %28 = arith.maximumf %26, %27 : vector<8x128xf32>
    %29 = arith.truncf %28 : vector<8x128xf32> to vector<8x128xbf16>
    %c0_10 = arith.constant 0 : index
    %c0_11 = arith.constant 0 : index
    %30 = vector.load %arg6[%c0_10, %c0_11] : memref<128x128xbf16, #tpu.memory_space<vmem>>, vector<128x128xbf16>
    %cst_12 = arith.constant dense<0.000000e+00> : vector<8x128xf32>
    %31 = tpu.matmul %29, %30, %cst_12 {dimension_numbers = #tpu.dot_dimension_numbers<[1], [0], [0], [1], [0, 0, 1, 1], [], []>} : vector<8x128xbf16>, vector<128x128xbf16>, vector<8x128xf32> -> vector<8x128xf32>
    %c0_13 = arith.constant 0 : index
    %c0_14 = arith.constant 0 : index
    %32 = vector.load %arg7[%c0_13, %c0_14] : memref<1x128xf32, #tpu.memory_space<vmem>>, vector<1x128xf32>
    %33 = vector.broadcast %32 : vector<1x128xf32> to vector<8x128xf32>
    %34 = arith.addf %31, %33 : vector<8x128xf32>
    %cst_15 = arith.constant 0.000000e+00 : f32
    %35 = vector.broadcast %cst_15 : f32 to vector<8x128xf32>
    %36 = arith.maximumf %34, %35 : vector<8x128xf32>
    %37 = arith.truncf %36 : vector<8x128xf32> to vector<8x128xbf16>
    %c0_16 = arith.constant 0 : index
    %c0_17 = arith.constant 0 : index
    %38 = vector.load %arg8[%c0_16, %c0_17] : memref<128x128xbf16, #tpu.memory_space<vmem>>, vector<128x128xbf16>
    %cst_18 = arith.constant dense<0.000000e+00> : vector<8x128xf32>
    %39 = tpu.matmul %37, %38, %cst_18 {dimension_numbers = #tpu.dot_dimension_numbers<[1], [0], [0], [1], [0, 0, 1, 1], [], []>} : vector<8x128xbf16>, vector<128x128xbf16>, vector<8x128xf32> -> vector<8x128xf32>
    %c0_19 = arith.constant 0 : index
    %c0_20 = arith.constant 0 : index
    %40 = vector.load %arg9[%c0_19, %c0_20] : memref<1x128xf32, #tpu.memory_space<vmem>>, vector<1x128xf32>
    %41 = vector.broadcast %40 : vector<1x128xf32> to vector<8x128xf32>
    %42 = arith.addf %39, %41 : vector<8x128xf32>
    %cst_21 = arith.constant 0.000000e+00 : f32
    %43 = vector.broadcast %cst_21 : f32 to vector<8x128xf32>
    %44 = arith.maximumf %42, %43 : vector<8x128xf32>
    %c0_22 = arith.constant 0 : index
    %c0_23 = arith.constant 0 : index
    %45 = vector.load %arg10[%c0_22, %c0_23] : memref<1x128xf32, #tpu.memory_space<vmem>>, vector<1x128xf32>
    %46 = vector.broadcast %45 : vector<1x128xf32> to vector<8x128xf32>
    %47 = arith.mulf %44, %46 : vector<8x128xf32>
    %cst_24 = arith.constant dense<0.000000e+00> : vector<8xf32>
    %48 = vector.multi_reduction <add>, %47, %cst_24 [1] : vector<8x128xf32> to vector<8xf32>
    %49 = vector.shape_cast %48 : vector<8xf32> to vector<8x1xf32>
    %c0_25 = arith.constant 0 : index
    %c0_26 = arith.constant 0 : index
    %50 = vector.load %arg11[%c0_25, %c0_26] : memref<1x1xf32, #tpu.memory_space<vmem>>, vector<1x1xf32>
    %51 = vector.broadcast %50 : vector<1x1xf32> to vector<8x1xf32>
    %52 = arith.addf %49, %51 : vector<8x1xf32>
    %53 = math.absf %52 : vector<8x1xf32>
    %cst_27 = arith.constant 0.000000e+00 : f32
    %54 = vector.broadcast %cst_27 : f32 to vector<8x1xf32>
    %55 = arith.subf %54, %53 : vector<8x1xf32>
    %56 = math.exp %55 : vector<8x1xf32>
    %cst_28 = arith.constant 1.000000e+00 : f32
    %57 = vector.broadcast %cst_28 : f32 to vector<8x1xf32>
    %58 = arith.addf %57, %56 : vector<8x1xf32>
    %59 = tpu.reciprocal %58 {approx = true} : vector<8x1xf32> -> vector<8x1xf32>
    %cst_29 = arith.constant 0.000000e+00 : f32
    %60 = vector.broadcast %cst_29 : f32 to vector<8x1xf32>
    %61 = arith.cmpf oge, %52, %60 : vector<8x1xf32>
    %cst_30 = arith.constant 1.000000e+00 : f32
    %62 = vector.broadcast %cst_30 : f32 to vector<8x1xf32>
    %63 = arith.subf %62, %59 : vector<8x1xf32>
    %64 = arith.select %61, %59, %63 : vector<8x1xi1>, vector<8x1xf32>
    %c0_31 = arith.constant 0 : index
    %c0_32 = arith.constant 0 : index
    %65 = vector.load %arg12[%c0_31, %c0_32] : memref<8x2xf32, #tpu.memory_space<vmem>>, vector<8x1xf32>
    tpu.vector_store %arg12[%c0_31, %c0_32], %52 {strides = array<i32>} : memref<8x2xf32, #tpu.memory_space<vmem>>, vector<8x1xf32>,
    %c0_33 = arith.constant 0 : index
    %c1 = arith.constant 1 : index
    %66 = vector.load %arg12[%c0_33, %c1] : memref<8x2xf32, #tpu.memory_space<vmem>>, vector<8x1xf32>
    tpu.vector_store %arg12[%c0_33, %c1], %64 {strides = array<i32>} : memref<8x2xf32, #tpu.memory_space<vmem>>, vector<8x1xf32>,
    return
  }
  func.func @transform_0(%arg0: i32) -> (i32, i32) {
    %c0_i32 = arith.constant 0 : i32
    %c0_i32_0 = arith.constant 0 : i32
    return %arg0, %c0_i32 : i32, i32
  }
  func.func @transform_1(%arg0: i32) -> (i32, i32) {
    %c0_i32 = arith.constant 0 : i32
    %c0_i32_0 = arith.constant 0 : i32
    return %arg0, %c0_i32 : i32, i32
  }
  func.func @transform_2(%arg0: i32) -> (i32, i32) {
    %c0_i32 = arith.constant 0 : i32
    %c0_i32_0 = arith.constant 0 : i32
    %c0_i32_1 = arith.constant 0 : i32
    return %c0_i32, %c0_i32_0 : i32, i32
  }
  func.func @transform_3(%arg0: i32) -> (i32, i32) {
    %c0_i32 = arith.constant 0 : i32
    %c0_i32_0 = arith.constant 0 : i32
    %c0_i32_1 = arith.constant 0 : i32
    return %c0_i32, %c0_i32_0 : i32, i32
  }
  func.func @transform_4(%arg0: i32) -> (i32, i32) {
    %c0_i32 = arith.constant 0 : i32
    %c0_i32_0 = arith.constant 0 : i32
    %c0_i32_1 = arith.constant 0 : i32
    return %c0_i32, %c0_i32_0 : i32, i32
  }
  func.func @transform_5(%arg0: i32) -> (i32, i32) {
    %c0_i32 = arith.constant 0 : i32
    %c0_i32_0 = arith.constant 0 : i32
    %c0_i32_1 = arith.constant 0 : i32
    return %c0_i32, %c0_i32_0 : i32, i32
  }
  func.func @transform_6(%arg0: i32) -> (i32, i32) {
    %c0_i32 = arith.constant 0 : i32
    %c0_i32_0 = arith.constant 0 : i32
    %c0_i32_1 = arith.constant 0 : i32
    return %c0_i32, %c0_i32_0 : i32, i32
  }
  func.func @transform_7(%arg0: i32) -> (i32, i32) {
    %c0_i32 = arith.constant 0 : i32
    %c0_i32_0 = arith.constant 0 : i32
    %c0_i32_1 = arith.constant 0 : i32
    return %c0_i32, %c0_i32_0 : i32, i32
  }
  func.func @transform_8(%arg0: i32) -> (i32, i32) {
    %c0_i32 = arith.constant 0 : i32
    %c0_i32_0 = arith.constant 0 : i32
    %c0_i32_1 = arith.constant 0 : i32
    return %c0_i32, %c0_i32_0 : i32, i32
  }
  func.func @transform_9(%arg0: i32) -> (i32, i32) {
    %c0_i32 = arith.constant 0 : i32
    %c0_i32_0 = arith.constant 0 : i32
    %c0_i32_1 = arith.constant 0 : i32
    return %c0_i32, %c0_i32_0 : i32, i32
  }
  func.func @transform_10(%arg0: i32) -> (i32, i32) {
    %c0_i32 = arith.constant 0 : i32
    %c0_i32_0 = arith.constant 0 : i32
    %c0_i32_1 = arith.constant 0 : i32
    return %c0_i32, %c0_i32_0 : i32, i32
  }
  func.func @transform_11(%arg0: i32) -> (i32, i32) {
    %c0_i32 = arith.constant 0 : i32
    %c0_i32_0 = arith.constant 0 : i32
    return %arg0, %c0_i32 : i32, i32
  }
}

</mosaic_0001>

<bundles_post_ra>
// kernel: tpu_custom_call.1
= control target key start
LH: loop header
LB: loop body
LE: loop exit
PB: predicated region body
PF: predicated region fallthrough
CT: control target
= control target key end

     0   :  { %s927_s0 = inlined_call_operand.hbm [shape: f32[8,144], index: 0, kind: input, shape index: {}]   ;;  %s928_s1 = inlined_call_operand.vmem [shape: f32[8,3], index: 1, kind: input, shape index: {}]   ;;  %s929_s2 = inlined_call_operand.hbm [shape: bf16[144,128], index: 2, kind: input, shape index: {}]   ;;  %s930_s3 = inlined_call_operand.vmem [shape: f32[3,128], index: 3, kind: input, shape index: {}]   ;;  %s931_s4 = inlined_call_operand.vmem [shape: f32[1,128], index: 4, kind: input, shape index: {}]   ;;  %s932_s5 = inlined_call_operand.hbm [shape: bf16[128,128], index: 5, kind: input, shape index: {}]   ;;  %s933_s6 = inlined_call_operand.vmem [shape: f32[1,128], index: 6, kind: input, shape index: {}]   ;;  %s934_s7 = inlined_call_operand.hbm [shape: bf16[128,128], index: 7, kind: input, shape index: {}]   ;;  %s935_s8 = inlined_call_operand.vmem [shape: f32[1,128], index: 8, kind: input, shape index: {}]   ;;  %s936_s9 = inlined_call_operand.vmem [shape: f32[1,128], index: 9, kind: input, shape index: {}]   ;;  %s937_s10 = inlined_call_operand.<no memory space> [shape: f32[1,1], index: 10, kind: input, shape index: {}]   ;;  %s938_s11 = inlined_call_operand.vmem [shape: f32[8,2], index: 11, kind: output, shape index: {}]  }
   0x1   :  { %v16_v0 = vstv %s937_s10 }
   0x2   :  { %17 = vst [vmem:[#allocation2] sm:$0x1] %v16_v0 }
   0x3   :  { %18 = vsyncpa [#allocation4], 0 }
   0x4   :  { %19 = vsyncpa [#allocation6], 0 }
   0x5   :  { %20 = vsyncpa [#allocation9], 0  ;;  %s751_s19 = smov [#allocation5]   ;;  %s657_s23 = scalar_lea.hbm %s929_s2, 1152 }
   0x6   :  { %s38_s20 = sshll.u32 %s751_s19, 4  ;;  %p658_p0 = scmp.ne.s32.totalorder %s929_s2, %s657_s23  ;;  %s39_s20 = int_to_ptr.vmem [resolvable:$true] %s38_s20 }
   0x7   :  { %p661_p1 = scmp.lt.u32.totalorder %s657_s23, %s929_s2 }
   0x9   :  { %p663_p2 = pnand %p661_p1, %p658_p0 }
   0xb   :  { %666 = shalt.err (!%p663_p2)
}
   0xc   :  { %s667_s10 = scalar_lea.vmem %s39_s20, 1152  ;;  %p672_p4 = scmp.lt.s32.totalorder %s39_s20, %s39_s20 }
   0xd   :  { %p668_p3 = scmp.ne.s32.totalorder %s39_s20, %s667_s10  ;;  %p673_p5 = scmp.lt.s32.totalorder %s667_s10, %s667_s10 }
   0xf   :  { %p674_p6 = por %p673_p5, %p672_p4 }
  0x11   :  { %p675_p7 = pnand %p674_p6, %p668_p3 }
  0x13   :  { %678 = shalt.err (!%p675_p7)
}
  0x14   :  { %s752_s28 = smov 64   ;;  %s753_s29 = smov 4  }
  0x15   :  { %44 = dma.hbm_to_vmem [thread:$0]  %s929_s2, 1152, %s39_s20, [#allocation6], %s752_s28, %s752_s28, %s753_s29  }
  0x16   :  { %s754_s13 = smov [#allocation3]   ;;  %s755_s15 = smov [#allocation7]  }
  0x17   :  { %s27_s14 = sshll.u32 %s754_s13, 4  ;;  %s54_s16 = sshll.u32 %s755_s15, 4  ;;  %s28_s14 = int_to_ptr.vmem [resolvable:$true] %s27_s14  ;;  %s55_s16 = int_to_ptr.vmem [resolvable:$true] %s54_s16 }
  0x18   :  { %s679_s19 = scalar_lea.hbm %s927_s0, 256 }
  0x19   :  { %p680_p8 = scmp.ne.s32.totalorder %s927_s0, %s679_s19  ;;  %p683_p9 = scmp.lt.u32.totalorder %s679_s19, %s927_s0 }
  0x1b   :  { %p685_p10 = pnand %p683_p9, %p680_p8 }
  0x1d   :  { %688 = shalt.err (!%p685_p10)
}
  0x1e   :  { %s689_s2 = scalar_lea.vmem %s28_s14, 256  ;;  %p694_p12 = scmp.lt.s32.totalorder %s28_s14, %s28_s14 }
  0x1f   :  { %p690_p11 = scmp.ne.s32.totalorder %s28_s14, %s689_s2  ;;  %p695_p13 = scmp.lt.s32.totalorder %s689_s2, %s689_s2 }
  0x21   :  { %p696_p0 = por %p695_p13, %p694_p12 }
  0x23   :  { %p697_p1 = pnand %p696_p0, %p690_p11 }
  0x25   :  { %700 = shalt.err (!%p697_p1)
}
  0x26   :  { %30 = dma.hbm_to_vmem [thread:$0]  %s927_s0, 256, %s28_s14, [#allocation4]  }
  0x27   :  { %s701_s10 = scalar_lea.hbm %s932_s5, 1024 }
  0x28   :  { %p702_p2 = scmp.ne.s32.totalorder %s932_s5, %s701_s10  ;;  %p705_p3 = scmp.lt.u32.totalorder %s701_s10, %s932_s5 }
  0x2a   :  { %p707_p4 = pnand %p705_p3, %p702_p2 }
  0x2c   :  { %710 = shalt.err (!%p707_p4)
}
  0x2d   :  { %s711_s17 = scalar_lea.vmem %s55_s16, 1024  ;;  %p716_p6 = scmp.lt.s32.totalorder %s55_s16, %s55_s16 }
  0x2e   :  { %p712_p5 = scmp.ne.s32.totalorder %s55_s16, %s711_s17  ;;  %p717_p7 = scmp.lt.s32.totalorder %s711_s17, %s711_s17 }
  0x30   :  { %p718_p8 = por %p717_p7, %p716_p6 }
  0x32   :  { %p719_p9 = pnand %p718_p8, %p712_p5 }
  0x34   :  { %722 = shalt.err (!%p719_p9)
}
  0x35   :  { %60 = dma.hbm_to_vmem [thread:$0]  %s932_s5, 1024, %s55_s16, [#allocation6], %s752_s28, %s752_s28, %s753_s29  }
  0x36   :  { %s756_s18 = smov [#allocation8]   ;;  %s723_s23 = scalar_lea.hbm %s934_s7, 1024 }
  0x37   :  { %s68_s19 = sshll.u32 %s756_s18, 4  ;;  %p724_p10 = scmp.ne.s32.totalorder %s934_s7, %s723_s23  ;;  %s69_s19 = int_to_ptr.vmem [resolvable:$true] %s68_s19 }
  0x38   :  { %p727_p11 = scmp.lt.u32.totalorder %s723_s23, %s934_s7 }
  0x3a   :  { %p729_p12 = pnand %p727_p11, %p724_p10 }
  0x3c   :  { %732 = shalt.err (!%p729_p12)
}
  0x3d   :  { %s733_s26 = scalar_lea.vmem %s69_s19, 1024  ;;  %p738_p0 = scmp.lt.s32.totalorder %s69_s19, %s69_s19 }
  0x3e   :  { %p734_p13 = scmp.ne.s32.totalorder %s69_s19, %s733_s26  ;;  %p739_p1 = scmp.lt.s32.totalorder %s733_s26, %s733_s26 }
  0x40   :  { %p740_p2 = por %p739_p1, %p738_p0 }
  0x42   :  { %p741_p3 = pnand %p740_p2, %p734_p13 }
  0x44   :  { %744 = shalt.err (!%p741_p3)
}
  0x45   :  { %74 = dma.hbm_to_vmem [thread:$0]  %s934_s7, 1024, %s69_s19, [#allocation9], %s752_s28, %s752_s28, %s753_s29  }
  0x46   :  { %745 = dma.done.wait [#allocation4], 256  }
  0x47   :  { %746 = vsyncadd [#allocation4], 4294967040 }
  0x48   :  { %747 = dma.done.wait [#allocation6], 2176  }
  0x49   :  { %748 = vsyncadd [#allocation6], 4294965120 }
  0x4a   :  { %749 = dma.done.wait [#allocation9], 1024  }
  0x4b   :  { %750 = vsyncadd [#allocation9], 4294966272  ;;  %v757_v1 = vmov 0   ;;  %v758_v2 = vmov 2   ;;  %v759_v3 = vmov 0.0   ;;  %v628_v4 = vld [vmem:[#allocation5] sm:$0xff]   ;;  %v228_v27 = vlaneseq }
  0x4c   :  { %181 = vmatprep.subr.bf16.mxu0 %v757_v1  ;;  %624 = vset.pattern.permute.xlu0 %v757_v1  ;;  %v629_v5 = vld [vmem:[#allocation5 + $0x8] sm:$0xff]   ;;  %v630_v6 = vld [vmem:[#allocation5 + $0x10] sm:$0xff]   ;;  %v631_v7 = vld [vmem:[#allocation5 + $0x18] sm:$0xff]   ;;  %vm177_vm0 = vcmask 130048   ;;  %v760_v14 = vmov 1   ;;  %vm761_vm1 = vmmov 0  }
  0x4d   :  { %626 = vset.pattern.permute.xlu1 %v758_v2  ;;  %572 = vmatprep.subr.bf16.mxu1 %v759_v3  ;;  %v95_v8 = vld [vmem:[#allocation3 + $0x8] sm:$0xff]  ;;  %v221_v9 = vld [vmem:[%s928_s1] sm:$0xff]  ;;  %v632_v13 = vld [vmem:[#allocation5 + $0x20] sm:$0xff]   ;;  %v229_v28 = vshrl.u32 %v228_v27, 7  ;;  %vm508_vm2 = vcmask 7168   ;;  %vm514_vm4 = vcmask 15368  }
  0x4e   :  { %182 = vmatpush1.bf16.msra.mxu0 %v628_v4  ;;  %v97_v10 = vpack.c.bf16 %v95_v8, %v95_v8  ;;  %225 = vperm.xlu0 %624, %v221_v9   ;;  %v637_v11 = vld [vmem:[#allocation7] sm:$0xff]   ;;  %v638_v12 = vld [vmem:[#allocation7 + $0x8] sm:$0xff]   ;;  %v639_v15 = vld [vmem:[#allocation7 + $0x10] sm:$0xff]  }
  0x4f   :  { %183 = vmatprep.subr.bf16.mxu0 %v757_v1  ;;  %245 = vperm.xlu1 %626, %v221_v9   ;;  %v633_v16 = vld [vmem:[#allocation5 + $0x28] sm:$0xff]   ;;  %v640_v17 = vld [vmem:[#allocation7 + $0x18] sm:$0xff]   ;;  %v634_v18 = vld [vmem:[#allocation5 + $0x30] sm:$0xff]   ;;  %v230_v30 = vsub.s32 0, %v229_v28  ;;  %v240_v31 = vsub.s32 1, %v229_v28  ;;  %v250_v33 = vsub.s32 2, %v229_v28 }
  0x50   :  { %533 = vmatprep.mubr.msk.bf16.mxu0 %vm177_vm0, %v97_v10  ;;  %573 = vmatpush3.bf16.msra.mxu1 %v637_v11  ;;  %v641_v19 = vld [vmem:[#allocation7 + $0x20] sm:$0xff]   ;;  %v635_v20 = vld [vmem:[#allocation5 + $0x38] sm:$0xff]   ;;  %v636_v21 = vld [vmem:[#allocation5 + $0x40] sm:$0xff]  }
  0x51   :  { %574 = vmatprep.subr.bf16.mxu1 %v759_v3  ;;  %v94_v22 = vld [vmem:[#allocation3] sm:$0xff]  ;;  %v643_v25 = vld [vmem:[#allocation7 + $0x30] sm:$0xff]   ;;  %v644_v26 = vld [vmem:[#allocation7 + $0x38] sm:$0xff]   ;;  %588 = vmatprep.mubr.msk.bf16.mxu1 %vm761_vm1, %v759_v3 }
  0x52   :  { %184 = vmatpush1.bf16.msra.mxu0 %v629_v5  ;;  %625 = vset.pattern.permute.xlu0 %v760_v14  ;;  %v96_v23 = vpack.c.bf16 %v94_v22, %v94_v22  ;;  %v642_v24 = vld [vmem:[#allocation7 + $0x28] sm:$0xff]   ;;  %v523_v36 = vld [vmem:[%s931_s4] ss:$0 sm:$0xff]  ;;  %v647_v55 = vld [vmem:[#allocation8 + $0x10] sm:$0xff]  }
  0x53   :  { %185 = vmatprep.subr.bf16.mxu0 %v757_v1  ;;  %235 = vperm.xlu0 %625, %v221_v9   ;;  %v222_v32 = vld [vmem:[%s930_s3] sm:$0x7]  ;;  %v648_v56 = vld [vmem:[#allocation8 + $0x18] sm:$0xff]   ;;  %v651_v59 = vld [vmem:[#allocation8 + $0x30] sm:$0xff]  }
  0x54   :  { %575 = vmatpush3.bf16.msra.mxu1 %v638_v12  ;;  %v231_v34 = vrot.slane %v222_v32, %v230_v30  ;;  %v241_v35 = vrot.slane %v222_v32, %v240_v31  ;;  %v251_v38 = vrot.slane %v222_v32, %v250_v33  ;;  %v645_v52 = vld [vmem:[#allocation8] sm:$0xff]   ;;  %v646_v54 = vld [vmem:[#allocation8 + $0x8] sm:$0xff]   ;;  %v652_v60 = vld [vmem:[#allocation8 + $0x38] sm:$0xff]  }
  0x55   :  { %576 = vmatprep.subr.bf16.mxu1 %v759_v3  ;;  %v649_v57 = vld [vmem:[#allocation8 + $0x20] sm:$0xff]   ;;  %v650_v58 = vld [vmem:[#allocation8 + $0x28] sm:$0xff]  }
  0x56   :  { %186 = vmatpush1.bf16.msra.mxu0 %v630_v6  ;;  %v534_v61 = vld [vmem:[%s933_s6] ss:$0 sm:$0xff] }
  0x57   :  { %187 = vmatprep.subr.bf16.mxu0 %v757_v1  ;;  %627 = vset.pattern.permute.xlu0 %v758_v2  ;;  %v543_v6 = vld [vmem:[%s935_s8] ss:$0 sm:$0xff]  ;;  %s762_s8 = smov 1  }
  0x58   :  { %577 = vmatpush3.bf16.msra.mxu1 %v639_v15  ;;  %v552_v10 = vld [vmem:[%s936_s9] ss:$0 sm:$0xff] }
  0x59   :  { %578 = vmatprep.subr.bf16.mxu1 %v759_v3  ;;  %v553_v14 = vld [vmem:[#allocation2] ss:$0 sm:$0xff] }
  0x5a   :  { %188 = vmatpush1.bf16.msra.mxu0 %v631_v7 }
  0x5b   :  { %189 = vmatprep.subr.bf16.mxu0 %v757_v1 }
  0x5c   :  { %579 = vmatpush3.bf16.msra.mxu1 %v640_v17 }
  0x5d   :  { %580 = vmatprep.subr.bf16.mxu1 %v759_v3 }
  0x5e   :  { %190 = vmatpush1.bf16.msra.mxu0 %v632_v13 }
  0x5f   :  { %191 = vmatprep.subr.bf16.mxu0 %v757_v1 }
  0x60   :  { %581 = vmatpush3.bf16.msra.mxu1 %v641_v19 }
  0x61   :  { %582 = vmatprep.subr.bf16.mxu1 %v759_v3 }
  0x62   :  { %192 = vmatpush1.bf16.msra.mxu0 %v633_v16 }
  0x63   :  { %193 = vmatprep.subr.bf16.mxu0 %v757_v1 }
  0x64   :  { %583 = vmatpush3.bf16.msra.mxu1 %v642_v24 }
  0x65   :  { %584 = vmatprep.subr.bf16.mxu1 %v759_v3 }
  0x66   :  { %194 = vmatpush1.bf16.msra.mxu0 %v634_v18 }
  0x67   :  { %195 = vmatprep.subr.bf16.mxu0 %v757_v1 }
  0x68   :  { %585 = vmatpush3.bf16.msra.mxu1 %v643_v25 }
  0x69   :  { %586 = vmatprep.subr.bf16.mxu1 %v759_v3 }
  0x6a   :  { %196 = vmatpush1.bf16.msra.mxu0 %v635_v20 }
  0x6b   :  { %197 = vmatprep.subr.bf16.mxu0 %v757_v1 }
  0x6c   :  { %587 = vmatpush3.bf16.msra.mxu1 %v644_v26 }
  0x6d   :  { %592 = vmatprep.subr.bf16.mxu1 %v759_v3 }
  0x6e   :  { %198 = vmatpush1.bf16.msra.mxu0 %v636_v21 }
  0x71   :  { %214 = vmatmul.mubr.bf16.vlgmr.msra.gmra.mrb[0].mxu0 %v96_v23 }
  0xcd   :  { %v226_v29 = vpop.permute.xlu0 %225 }
  0xce   :  { %v246_v40 = vpop.permute.xlu1 %245  ;;  %v232_v41 = vmul.f32 %v231_v34, %v226_v29 }
  0xcf   :  { %v252_v48 = vmul.f32 %v251_v38, %v246_v40 }
  0xd2   :  { %v236_v37 = vpop.permute.xlu0 %235 }
  0xd3   :  { %v242_v44 = vmul.f32 %v241_v35, %v236_v37 }
 0x144   :  { %v215_v39 = vpop.f32.mrb[0].mxu0 }
 0x145   :  { %v216_v42 = vadd.f32 %v523_v36, %v215_v39  ;;  %v217_v43 = vpop.f32.mrb[1].mxu0 }
 0x146   :  { %v218_v45 = vpop.f32.mrb[2].mxu0 }
 0x147   :  { %v233_v46 = vadd.f32 %v232_v41, %v216_v42  ;;  %v219_v47 = vpop.f32.mrb[3].mxu0 }
 0x149   :  { %v243_v49 = vadd.f32 %v242_v44, %v233_v46 }
 0x14b   :  { %v253_v50 = vadd.f32 %v252_v48, %v243_v49 }
 0x14d   :  { %v254_v51 = vmax.f32 %v253_v50, 0.0 }
 0x14f   :  { %v255_v53 = vpack.c.bf16 %v254_v51, %v254_v51 }
 0x151   :  { %589 = vmatmul.mubr.bf16.vlgmr.msra.gmra.mrb[0].mxu1 %v255_v53 }
 0x152   :  { %593 = vmatpush3.bf16.msra.mxu1 %v645_v52  ;;  %608 = vmatprep.mubr.msk.bf16.mxu1 %vm761_vm1, %v759_v3 }
 0x153   :  { %594 = vmatprep.subr.bf16.mxu1 %v759_v3 }
 0x156   :  { %595 = vmatpush3.bf16.msra.mxu1 %v646_v54 }
 0x157   :  { %596 = vmatprep.subr.bf16.mxu1 %v759_v3 }
 0x15a   :  { %597 = vmatpush3.bf16.msra.mxu1 %v647_v55 }
 0x15b   :  { %598 = vmatprep.subr.bf16.mxu1 %v759_v3 }
 0x15e   :  { %599 = vmatpush3.bf16.msra.mxu1 %v648_v56 }
 0x15f   :  { %600 = vmatprep.subr.bf16.mxu1 %v759_v3 }
 0x162   :  { %601 = vmatpush3.bf16.msra.mxu1 %v649_v57 }
 0x163   :  { %602 = vmatprep.subr.bf16.mxu1 %v759_v3 }
 0x166   :  { %603 = vmatpush3.bf16.msra.mxu1 %v650_v58 }
 0x167   :  { %604 = vmatprep.subr.bf16.mxu1 %v759_v3 }
 0x16a   :  { %605 = vmatpush3.bf16.msra.mxu1 %v651_v59 }
 0x16b   :  { %606 = vmatprep.subr.bf16.mxu1 %v759_v3 }
 0x16e   :  { %607 = vmatpush3.bf16.msra.mxu1 %v652_v60 }
 0x224   :  { %v361_v62 = vpop.f32.mrb[0].mxu1 }
 0x225   :  { %v362_v63 = vadd.f32 %v534_v61, %v361_v62  ;;  %v590_v0 = vpop.f32.mrb[1].mxu1 }
 0x226   :  { %v364_v1 = vpop.f32.mrb[2].mxu1 }
 0x227   :  { %v367_v2 = vmax.f32 %v362_v63, 0.0  ;;  %v591_v4 = vpop.f32.mrb[3].mxu1 }
 0x229   :  { %v368_v5 = vpack.c.bf16 %v367_v2, %v367_v2 }
 0x22b   :  { %609 = vmatmul.mubr.bf16.vlgmr.msra.gmra.mrb[4].mxu1 %v368_v5 }
 0x2fe   :  { %v474_v7 = vpop.f32.mrb[4].mxu1 }
 0x2ff   :  { %v475_v3 = vadd.f32 %v543_v6, %v474_v7  ;;  %v610_v8 = vpop.f32.mrb[5].mxu1 }
 0x300   :  { %v477_v9 = vpop.f32.mrb[6].mxu1 }
 0x301   :  { %v480_v11 = vmax.f32 %v475_v3, 0.0  ;;  %v611_v12 = vpop.f32.mrb[7].mxu1 }
 0x303   :  { %v488_v13 = vmul.f32 %v552_v10, %v480_v11 }
 0x305   :  { %489 = vadd.xlane.f32.xlu1 %v488_v13 }
 0x392   :  { %v490_v15 = vpop.xlane.xlu1 %489 }
 0x393   :  { %v498_v16 = vadd.f32 %v553_v14, %v490_v15 }
 0x395   :  { %v499_v17 = vand.u32 2147483647, %v498_v16  ;;  %509 = vst.msk [vmem:[%s938_s11] sm:$0xff] %vm508_vm2, %v498_v16  ;;  %vm505_vm3 = vcmp.ge.f32.partialorder %v498_v16, 0.0 }
 0x397   :  { %v500_v18 = vsub.f32 0.0, %v499_v17 }
 0x399   :  { %v501_v19 = vmul.f32 1.442695, %v500_v18 }
 0x39b   :  { %653 = vpow2.f32 %v501_v19 }
 0x3a5   :  { %v654_v20 = vpop.eup %653 }
 0x3a6   :  { %v503_v21 = vadd.f32 1.0, %v654_v20 }
 0x3a8   :  { %655 = vrcp.f32 %v503_v21 }
 0x3b2   :  { %v656_v22 = vpop.eup %655 }
 0x3b3   :  { %v506_v23 = vsub.f32 1.0, %v656_v22 }
 0x3b5   :  { %v507_v24 = vsel %vm505_vm3, %v656_v22, %v506_v23 }
 0x3b6   :  { %511 = vrot.lane.b32.xlu0 %v507_v24, %s762_s8 }
 0x428   :  { %v512_v25 = vpop.permute.xlu0 %511 }
 0x429   :  { %515 = vst.msk [vmem:[%s938_s11] sm:$0xff] %vm514_vm4, %v512_v25 }
 0x42a   :  { %520 = vsyncpa [#allocation4], 1 }
 0x42b   :  { %521 = vsyncpa [#allocation6], 1 }
 0x42c   :  { %522 = vsyncpa [#allocation9], 1 }

</bundles_post_ra>
